<compile_context>
chip_gen: v5e
topology: v5e:2x2
jax: 0.10.0
libtpu: 0.0.40
codegen_flags: <defaults>
</compile_context>

<pallas_src>
import math
from functools import partial

import jax
import jax.numpy as jnp
from jax.experimental import pallas as pl
from jax.experimental.pallas import tpu as pltpu  # noqa: F401  (kept for TPU backend import)

# ---- small, deterministic config (UniViTARVisionConfig analogue) ----
HIDDEN = 64          # hidden_size
HEADS = 4            # num_attention_heads
HEAD_DIM = HIDDEN // HEADS
BATCH = 2
SEQ = 8
EPS = 1e-6           # layer_norm_eps
DTYPE = jnp.bfloat16 # FlashAttention requires fp16/bf16


# ------------------------------------------------------------------
# Single fused kernel: qkv matmul -> RoPE(q,k) -> RMSNorm(q,k) ->
# attention (all (b, h) head blocks unrolled in one invocation) -> out proj.
# Everything stays resident in VMEM / vregs; no grid steps, no scratch refs.
# ------------------------------------------------------------------
def _fused_attention_kernel(x_ref, wqkv_ref, cos_ref, sina_ref, sinb_ref,
                            nw_ref, wproj_ref, bproj_ref, o_ref,
                            *, batch, seq, heads, hd, eps):
    C = heads * hd
    BS = batch * seq
    f32 = jnp.float32
    low = o_ref.dtype

    # ---- 1) qkv projection (qkv_bias=False): bf16 MXU matmul, f32 accumulate,
    #      cast back to the module dtype (matches torch Linear output dtype).
    qkv = jnp.dot(x_ref[...], wqkv_ref[...],
                  preferred_element_type=f32).astype(low)        # (BS, 3C)
    qk = qkv[:, :2 * C]        # (BS, 2C) = [q | k], lane-dense 128-wide tile
    v = qkv[:, 2 * C:]         # (BS, C)

    # ---- 2) RoPE on q||k in f32 (mirrors apply_rotary_pos_emb_vision).
    # rotate_half is done as two masked lane-rolls on the flat (2*H*D) axis:
    #   roll(-hd/2)[j] = x[j + hd/2]  -> pairs with sin_a (holds -sin on d <  hd/2)
    #   roll(+hd/2)[j] = x[j - hd/2]  -> pairs with sin_b (holds +sin on d >= hd/2)
    # The sin tables zero out any cross-head / cross-qk contamination at chunk
    # edges, so no reshape to (B,S,H,D) is ever needed.
    qk_f = qk.astype(f32)
    rot = (jnp.roll(qk_f, -hd // 2, axis=-1) * sina_ref[...]
           + jnp.roll(qk_f, hd // 2, axis=-1) * sinb_ref[...])
    r = (qk_f * cos_ref[...] + rot).astype(low)                  # .to(orig_dtype)

    # ---- 3) QK RMSNorm over the flattened hidden dim (two lane-range reduces).
    # nw_ref already carries the RMSNorm weights; its q-half additionally
    # carries the folded softmax scale (1/sqrt(head_dim)).
    rf = r.astype(f32)
    sq = rf * rf
    inv_q = jax.lax.rsqrt(jnp.sum(sq[:, :C], axis=-1, keepdims=True) * (1.0 / C) + eps)
    inv_k = jax.lax.rsqrt(jnp.sum(sq[:, C:], axis=-1, keepdims=True) * (1.0 / C) + eps)
    inv = jnp.concatenate([jnp.broadcast_to(inv_q, (BS, C)),
                           jnp.broadcast_to(inv_k, (BS, C))], axis=-1)
    normed = (rf * inv).astype(low)                              # .to(input_dtype)
    qk_n = (nw_ref[...] * normed.astype(f32)).astype(low)        # weight * x -> .to(target)

    # ---- 4) non-causal softmax attention; softmax scale already folded into q.
    # All (b, h) blocks unrolled inside this single invocation. Both matmuls
    # are bf16-in / f32-accumulate MXU ops; context is assembled in vregs.
    rows = []
    for b in range(batch):
        r0 = b * seq
        head_blocks = []
        for h in range(heads):
            c0 = h * hd
            qbh = qk_n[r0:r0 + seq, c0:c0 + hd]                   # (S, D) bf16
            kbh = qk_n[r0:r0 + seq, C + c0:C + c0 + hd]           # (S, D) bf16
            vbh = v[r0:r0 + seq, c0:c0 + hd]                      # (S, D) bf16
            s = jax.lax.dot_general(qbh, kbh, (((1,), (1,)), ((), ())),
                                    preferred_element_type=f32)   # (S, S) f32
            m = jnp.max(s, axis=-1, keepdims=True)
            p = jnp.exp(s - m)
            l = jnp.sum(p, axis=-1, keepdims=True)
            acc = jnp.dot(p.astype(low), vbh, preferred_element_type=f32)
            head_blocks.append(acc * pl.reciprocal(l, approx=True))
        rows.append(jnp.concatenate(head_blocks, axis=-1))        # (S, C) f32
    ctx = jnp.concatenate(rows, axis=0).astype(low)               # (BS, C) bf16

    # ---- 5) output projection (+ bias); proj_drop(p=0) is identity
    out = jnp.dot(ctx, wproj_ref[...], preferred_element_type=f32) + bproj_ref[...]
    o_ref[...] = out.astype(low)


# ------------------------------------------------------------------
# Wrapper: host-side prep of tiny RoPE / norm tables + one pallas_call
# ------------------------------------------------------------------
def attention_forward(params, hidden_states, rotary_pos_emb):
    B, S, C = hidden_states.shape
    H, D = HEADS, HEAD_DIM
    BS = B * S
    scale = 1.0 / math.sqrt(D)   # softmax_scale = 1/sqrt(head_dim)

    # cos/sin tiled twice along head_dim (apply_rotary_pos_emb_vision), then
    # tiled to the fused (BS, 2C) q||k layout; rotate_half's sign is folded
    # into the two sin tables so the kernel only needs rolls + multiplies.
    cos = jnp.concatenate([jnp.cos(rotary_pos_emb)] * 2, axis=-1).astype(jnp.float32)  # (S, D)
    sin = jnp.concatenate([jnp.sin(rotary_pos_emb)] * 2, axis=-1).astype(jnp.float32)
    didx = jnp.arange(D)
    sin_lo = jnp.where(didx < D // 2, -sin, 0.0)     # pairs with roll(-D/2)
    sin_hi = jnp.where(didx >= D // 2, sin, 0.0)     # pairs with roll(+D/2)
    cos2 = jnp.tile(cos, (B, 2 * H))                 # (BS, 2C)
    sina2 = jnp.tile(sin_lo, (B, 2 * H))
    sinb2 = jnp.tile(sin_hi, (B, 2 * H))

    # RMSNorm weights for q||k; softmax scale folded into the q half (free).
    nw = jnp.concatenate([params["q_norm_w"] * scale, params["k_norm_w"]]
                         ).reshape(1, 2 * C).astype(jnp.float32)

    kernel = partial(_fused_attention_kernel, batch=B, seq=S, heads=H, hd=D, eps=EPS)
    out = pl.pallas_call(
        kernel,
        out_shape=jax.ShapeDtypeStruct((BS, C), hidden_states.dtype),
    )(hidden_states.reshape(BS, C), params["w_qkv"], cos2, sina2, sinb2, nw,
      params["w_proj"], params["b_proj"].reshape(1, C))
    return out.reshape(B, S, C)


# ------------------------------------------------------------------
# Deterministic parameter init (same shapes as the torch module)
# ------------------------------------------------------------------
def init_params(key):
    k1, k2, k3, k4, k5 = jax.random.split(key, 5)
    w_qkv = (jax.random.normal(k1, (HIDDEN, 3 * HIDDEN), jnp.float32) * 0.02).astype(DTYPE)
    w_proj = (jax.random.normal(k2, (HIDDEN, HIDDEN), jnp.float32) * 0.02).astype(DTYPE)
    b_proj = (jax.random.normal(k3, (HIDDEN,), jnp.float32) * 0.02).astype(jnp.float32)
    # RMSNorm weights init to ones in torch; perturb slightly so the test exercises them
    q_norm_w = 1.0 + 0.1 * jax.random.normal(k4, (HIDDEN,), jnp.float32)
    k_norm_w = 1.0 + 0.1 * jax.random.normal(k5, (HIDDEN,), jnp.float32)
    return dict(w_qkv=w_qkv, w_proj=w_proj, b_proj=b_proj,
                q_norm_w=q_norm_w, k_norm_w=k_norm_w)


# ------------------------------------------------------------------
# Pure-JAX reference (mirrors the torch math & dtype casts)
# ------------------------------------------------------------------
def reference_forward(params, x, freqs):
    B, S, C = x.shape
    H, D = HEADS, HEAD_DIM
    qkv = (x.reshape(B * S, C).astype(jnp.float32)
           @ params["w_qkv"].astype(jnp.float32)).astype(DTYPE)      # qkv_bias=False
    qkv = qkv.reshape(B, S, 3, H, D)
    q, k, v = qkv[:, :, 0], qkv[:, :, 1], qkv[:, :, 2]
    cos = jnp.concatenate([jnp.cos(freqs)] * 2, -1)[None, :, None, :]
    sin = jnp.concatenate([jnp.sin(freqs)] * 2, -1)[None, :, None, :]

    def rope(t):
        tf = t.astype(jnp.float32)
        t1, t2 = tf[..., : D // 2], tf[..., D // 2:]
        rot = jnp.concatenate([-t2, t1], -1)
        return (tf * cos + rot * sin).astype(DTYPE)

    def rmsnorm(t, w):
        tf = t.reshape(B, S, C).astype(jnp.float32)
        var = jnp.mean(tf * tf, -1, keepdims=True)
        n = (tf * jax.lax.rsqrt(var + EPS)).astype(DTYPE)
        return (w * n.astype(jnp.float32)).reshape(B, S, H, D)

    q = rmsnorm(rope(q), params["q_norm_w"]).astype(DTYPE)
    k = rmsnorm(rope(k), params["k_norm_w"]).astype(DTYPE)
    s = jnp.einsum("bqhd,bkhd->bhqk",
                   q.astype(jnp.float32), k.astype(jnp.float32)) / math.sqrt(D)
    p = jax.nn.softmax(s, -1)
    ctx = jnp.einsum("bhqk,bkhd->bqhd",
                     p.astype(DTYPE).astype(jnp.float32),
                     v.astype(jnp.float32)).astype(DTYPE)
    out = (ctx.reshape(B * S, C).astype(jnp.float32)
           @ params["w_proj"].astype(jnp.float32) + params["b_proj"]).astype(DTYPE)
    return out.reshape(B, S, C)


if __name__ == "__main__":
    key = jax.random.PRNGKey(0)
    kp, kx = jax.random.split(key, 2)
    params = init_params(kp)

    x = jax.random.normal(kx, (BATCH, SEQ, HIDDEN), jnp.float32).astype(DTYPE)
    # rotary_pos_emb freqs: (S, head_dim // 2), standard rope frequencies
    inv_freq = 1.0 / (10000.0 ** (jnp.arange(0, HEAD_DIM // 2, dtype=jnp.float32)
                                  / (HEAD_DIM // 2)))
    pos = jnp.arange(SEQ, dtype=jnp.float32)
    freqs = jnp.outer(pos, inv_freq)  # (S, D/2)

    out = attention_forward(params, x, freqs)
    out = jax.block_until_ready(out)
    assert out.shape == (BATCH, SEQ, HIDDEN) and out.dtype == DTYPE

    ref = reference_forward(params, x, freqs)
    if not jnp.allclose(out.astype(jnp.float32), ref.astype(jnp.float32),
                        atol=3e-2, rtol=3e-2):
        raise AssertionError("Pallas output does not match reference")

    print("KERNEL_OK")
</pallas_src>

<mosaic_0001>
module attributes {stable_mosaic.version = 11 : i64} {
  func.func @_fused_attention_kernel(%arg0: memref<16x64xbf16, #tpu.memory_space<vmem>>, %arg1: memref<64x192xbf16, #tpu.memory_space<vmem>>, %arg2: memref<16x128xf32, #tpu.memory_space<vmem>>, %arg3: memref<16x128xf32, #tpu.memory_space<vmem>>, %arg4: memref<16x128xf32, #tpu.memory_space<vmem>>, %arg5: memref<1x128xf32, #tpu.memory_space<vmem>>, %arg6: memref<64x64xbf16, #tpu.memory_space<vmem>>, %arg7: memref<1x64xf32, #tpu.memory_space<vmem>>, %arg8: memref<16x64xbf16, #tpu.memory_space<vmem>>) attributes {dimension_semantics = [], scalar_prefetch = 0 : i64, scratch_operands = 0 : i64, tpu.core_type = #tpu.core_type<tc>} {
    %c0 = arith.constant 0 : index
    %c0_0 = arith.constant 0 : index
    %0 = vector.load %arg0[%c0, %c0_0] : memref<16x64xbf16, #tpu.memory_space<vmem>>, vector<16x64xbf16>
    %c0_1 = arith.constant 0 : index
    %c0_2 = arith.constant 0 : index
    %1 = vector.load %arg1[%c0_1, %c0_2] : memref<64x192xbf16, #tpu.memory_space<vmem>>, vector<64x192xbf16>
    %cst = arith.constant dense<0.000000e+00> : vector<16x192xf32>
    %2 = tpu.matmul %0, %1, %cst {dimension_numbers = #tpu.dot_dimension_numbers<[1], [0], [0], [1], [0, 0, 1, 1], [], []>} : vector<16x64xbf16>, vector<64x192xbf16>, vector<16x192xf32> -> vector<16x192xf32>
    %3 = arith.truncf %2 : vector<16x192xf32> to vector<16x192xbf16>
    %4 = vector.extract_strided_slice %3 {offsets = [0, 0], sizes = [16, 128], strides = [1, 1]} : vector<16x192xbf16> to vector<16x128xbf16>
    %5 = vector.extract_strided_slice %3 {offsets = [0, 128], sizes = [16, 64], strides = [1, 1]} : vector<16x192xbf16> to vector<16x64xbf16>
    %6 = arith.extf %4 : vector<16x128xbf16> to vector<16x128xf32>
    %7 = vector.extract_strided_slice %6 {offsets = [0, 8], sizes = [16, 120], strides = [1, 1]} : vector<16x128xf32> to vector<16x120xf32>
    %8 = vector.extract_strided_slice %6 {offsets = [0, 0], sizes = [16, 8], strides = [1, 1]} : vector<16x128xf32> to vector<16x8xf32>
    %9 = tpu.concatenate %7, %8 in 1 : vector<16x120xf32>, vector<16x8xf32> -> vector<16x128xf32>
    %c0_3 = arith.constant 0 : index
    %c0_4 = arith.constant 0 : index
    %10 = vector.load %arg3[%c0_3, %c0_4] : memref<16x128xf32, #tpu.memory_space<vmem>>, vector<16x128xf32>
    %11 = arith.mulf %9, %10 : vector<16x128xf32>
    %12 = vector.extract_strided_slice %6 {offsets = [0, 120], sizes = [16, 8], strides = [1, 1]} : vector<16x128xf32> to vector<16x8xf32>
    %13 = vector.extract_strided_slice %6 {offsets = [0, 0], sizes = [16, 120], strides = [1, 1]} : vector<16x128xf32> to vector<16x120xf32>
    %14 = tpu.concatenate %12, %13 in 1 : vector<16x8xf32>, vector<16x120xf32> -> vector<16x128xf32>
    %c0_5 = arith.constant 0 : index
    %c0_6 = arith.constant 0 : index
    %15 = vector.load %arg4[%c0_5, %c0_6] : memref<16x128xf32, #tpu.memory_space<vmem>>, vector<16x128xf32>
    %16 = arith.mulf %14, %15 : vector<16x128xf32>
    %17 = arith.addf %11, %16 : vector<16x128xf32>
    %c0_7 = arith.constant 0 : index
    %c0_8 = arith.constant 0 : index
    %18 = vector.load %arg2[%c0_7, %c0_8] : memref<16x128xf32, #tpu.memory_space<vmem>>, vector<16x128xf32>
    %19 = arith.mulf %6, %18 : vector<16x128xf32>
    %20 = arith.addf %19, %17 : vector<16x128xf32>
    %21 = arith.truncf %20 : vector<16x128xf32> to vector<16x128xbf16>
    %22 = arith.extf %21 : vector<16x128xbf16> to vector<16x128xf32>
    %23 = arith.mulf %22, %22 : vector<16x128xf32>
    %24 = vector.extract_strided_slice %23 {offsets = [0, 0], sizes = [16, 64], strides = [1, 1]} : vector<16x128xf32> to vector<16x64xf32>
    %cst_9 = arith.constant dense<0.000000e+00> : vector<16xf32>
    %25 = vector.multi_reduction <add>, %24, %cst_9 [1] : vector<16x64xf32> to vector<16xf32>
    %26 = vector.shape_cast %25 : vector<16xf32> to vector<16x1xf32>
    %cst_10 = arith.constant 1.562500e-02 : f32
    %27 = vector.broadcast %cst_10 : f32 to vector<16x1xf32>
    %28 = arith.mulf %26, %27 : vector<16x1xf32>
    %cst_11 = arith.constant 9.99999997E-7 : f32
    %29 = vector.broadcast %cst_11 : f32 to vector<16x1xf32>
    %30 = arith.addf %28, %29 : vector<16x1xf32>
    %31 = math.rsqrt %30 : vector<16x1xf32>
    %32 = vector.extract_strided_slice %23 {offsets = [0, 64], sizes = [16, 64], strides = [1, 1]} : vector<16x128xf32> to vector<16x64xf32>
    %cst_12 = arith.constant dense<0.000000e+00> : vector<16xf32>
    %33 = vector.multi_reduction <add>, %32, %cst_12 [1] : vector<16x64xf32> to vector<16xf32>
    %34 = vector.shape_cast %33 : vector<16xf32> to vector<16x1xf32>
    %cst_13 = arith.constant 1.562500e-02 : f32
    %35 = vector.broadcast %cst_13 : f32 to vector<16x1xf32>
    %36 = arith.mulf %34, %35 : vector<16x1xf32>
    %cst_14 = arith.constant 9.99999997E-7 : f32
    %37 = vector.broadcast %cst_14 : f32 to vector<16x1xf32>
    %38 = arith.addf %36, %37 : vector<16x1xf32>
    %39 = math.rsqrt %38 : vector<16x1xf32>
    %40 = vector.shape_cast %31 : vector<16x1xf32> to vector<16x1xf32>
    %41 = vector.broadcast %40 : vector<16x1xf32> to vector<16x64xf32>
    %42 = vector.shape_cast %39 : vector<16x1xf32> to vector<16x1xf32>
    %43 = vector.broadcast %42 : vector<16x1xf32> to vector<16x64xf32>
    %44 = tpu.concatenate %41, %43 in 1 : vector<16x64xf32>, vector<16x64xf32> -> vector<16x128xf32>
    %45 = arith.mulf %22, %44 : vector<16x128xf32>
    %46 = arith.truncf %45 : vector<16x128xf32> to vector<16x128xbf16>
    %c0_15 = arith.constant 0 : index
    %c0_16 = arith.constant 0 : index
    %47 = vector.load %arg5[%c0_15, %c0_16] : memref<1x128xf32, #tpu.memory_space<vmem>>, vector<1x128xf32>
    %48 = arith.extf %46 : vector<16x128xbf16> to vector<16x128xf32>
    %49 = vector.broadcast %47 : vector<1x128xf32> to vector<16x128xf32>
    %50 = arith.mulf %49, %48 : vector<16x128xf32>
    %51 = arith.truncf %50 : vector<16x128xf32> to vector<16x128xbf16>
    %52 = vector.extract_strided_slice %51 {offsets = [0, 0], sizes = [8, 16], strides = [1, 1]} : vector<16x128xbf16> to vector<8x16xbf16>
    %53 = vector.extract_strided_slice %51 {offsets = [0, 64], sizes = [8, 16], strides = [1, 1]} : vector<16x128xbf16> to vector<8x16xbf16>
    %54 = vector.extract_strided_slice %5 {offsets = [0, 0], sizes = [8, 16], strides = [1, 1]} : vector<16x64xbf16> to vector<8x16xbf16>
    %cst_17 = arith.constant dense<0.000000e+00> : vector<8x8xf32>
    %55 = tpu.matmul %52, %53, %cst_17 {dimension_numbers = #tpu.dot_dimension_numbers<[1], [1], [0], [0], [0, 0, 1, 0], [], []>} : vector<8x16xbf16>, vector<8x16xbf16>, vector<8x8xf32> -> vector<8x8xf32>
    %cst_18 = arith.constant dense<0xFF800000> : vector<8xf32>
    %56 = vector.multi_reduction <maximumf>, %55, %cst_18 [1] : vector<8x8xf32> to vector<8xf32>
    %57 = vector.shape_cast %56 : vector<8xf32> to vector<8x1xf32>
    %58 = vector.broadcast %57 : vector<8x1xf32> to vector<8x8xf32>
    %59 = arith.subf %55, %58 : vector<8x8xf32>
    %60 = math.exp %59 : vector<8x8xf32>
    %cst_19 = arith.constant dense<0.000000e+00> : vector<8xf32>
    %61 = vector.multi_reduction <add>, %60, %cst_19 [1] : vector<8x8xf32> to vector<8xf32>
    %62 = vector.shape_cast %61 : vector<8xf32> to vector<8x1xf32>
    %63 = arith.truncf %60 : vector<8x8xf32> to vector<8x8xbf16>
    %cst_20 = arith.constant dense<0.000000e+00> : vector<8x16xf32>
    %64 = tpu.matmul %63, %54, %cst_20 {dimension_numbers = #tpu.dot_dimension_numbers<[1], [0], [0], [1], [0, 0, 1, 1], [], []>} : vector<8x8xbf16>, vector<8x16xbf16>, vector<8x16xf32> -> vector<8x16xf32>
    %65 = tpu.reciprocal %62 {approx = true} : vector<8x1xf32> -> vector<8x1xf32>
    %66 = vector.broadcast %65 : vector<8x1xf32> to vector<8x16xf32>
    %67 = arith.mulf %64, %66 : vector<8x16xf32>
    %68 = vector.extract_strided_slice %51 {offsets = [0, 16], sizes = [8, 16], strides = [1, 1]} : vector<16x128xbf16> to vector<8x16xbf16>
    %69 = vector.extract_strided_slice %51 {offsets = [0, 80], sizes = [8, 16], strides = [1, 1]} : vector<16x128xbf16> to vector<8x16xbf16>
    %70 = vector.extract_strided_slice %5 {offsets = [0, 16], sizes = [8, 16], strides = [1, 1]} : vector<16x64xbf16> to vector<8x16xbf16>
    %cst_21 = arith.constant dense<0.000000e+00> : vector<8x8xf32>
    %71 = tpu.matmul %68, %69, %cst_21 {dimension_numbers = #tpu.dot_dimension_numbers<[1], [1], [0], [0], [0, 0, 1, 0], [], []>} : vector<8x16xbf16>, vector<8x16xbf16>, vector<8x8xf32> -> vector<8x8xf32>
    %cst_22 = arith.constant dense<0xFF800000> : vector<8xf32>
    %72 = vector.multi_reduction <maximumf>, %71, %cst_22 [1] : vector<8x8xf32> to vector<8xf32>
    %73 = vector.shape_cast %72 : vector<8xf32> to vector<8x1xf32>
    %74 = vector.broadcast %73 : vector<8x1xf32> to vector<8x8xf32>
    %75 = arith.subf %71, %74 : vector<8x8xf32>
    %76 = math.exp %75 : vector<8x8xf32>
    %cst_23 = arith.constant dense<0.000000e+00> : vector<8xf32>
    %77 = vector.multi_reduction <add>, %76, %cst_23 [1] : vector<8x8xf32> to vector<8xf32>
    %78 = vector.shape_cast %77 : vector<8xf32> to vector<8x1xf32>
    %79 = arith.truncf %76 : vector<8x8xf32> to vector<8x8xbf16>
    %cst_24 = arith.constant dense<0.000000e+00> : vector<8x16xf32>
    %80 = tpu.matmul %79, %70, %cst_24 {dimension_numbers = #tpu.dot_dimension_numbers<[1], [0], [0], [1], [0, 0, 1, 1], [], []>} : vector<8x8xbf16>, vector<8x16xbf16>, vector<8x16xf32> -> vector<8x16xf32>
    %81 = tpu.reciprocal %78 {approx = true} : vector<8x1xf32> -> vector<8x1xf32>
    %82 = vector.broadcast %81 : vector<8x1xf32> to vector<8x16xf32>
    %83 = arith.mulf %80, %82 : vector<8x16xf32>
    %84 = vector.extract_strided_slice %51 {offsets = [0, 32], sizes = [8, 16], strides = [1, 1]} : vector<16x128xbf16> to vector<8x16xbf16>
    %85 = vector.extract_strided_slice %51 {offsets = [0, 96], sizes = [8, 16], strides = [1, 1]} : vector<16x128xbf16> to vector<8x16xbf16>
    %86 = vector.extract_strided_slice %5 {offsets = [0, 32], sizes = [8, 16], strides = [1, 1]} : vector<16x64xbf16> to vector<8x16xbf16>
    %cst_25 = arith.constant dense<0.000000e+00> : vector<8x8xf32>
    %87 = tpu.matmul %84, %85, %cst_25 {dimension_numbers = #tpu.dot_dimension_numbers<[1], [1], [0], [0], [0, 0, 1, 0], [], []>} : vector<8x16xbf16>, vector<8x16xbf16>, vector<8x8xf32> -> vector<8x8xf32>
    %cst_26 = arith.constant dense<0xFF800000> : vector<8xf32>
    %88 = vector.multi_reduction <maximumf>, %87, %cst_26 [1] : vector<8x8xf32> to vector<8xf32>
    %89 = vector.shape_cast %88 : vector<8xf32> to vector<8x1xf32>
    %90 = vector.broadcast %89 : vector<8x1xf32> to vector<8x8xf32>
    %91 = arith.subf %87, %90 : vector<8x8xf32>
    %92 = math.exp %91 : vector<8x8xf32>
    %cst_27 = arith.constant dense<0.000000e+00> : vector<8xf32>
    %93 = vector.multi_reduction <add>, %92, %cst_27 [1] : vector<8x8xf32> to vector<8xf32>
    %94 = vector.shape_cast %93 : vector<8xf32> to vector<8x1xf32>
    %95 = arith.truncf %92 : vector<8x8xf32> to vector<8x8xbf16>
    %cst_28 = arith.constant dense<0.000000e+00> : vector<8x16xf32>
    %96 = tpu.matmul %95, %86, %cst_28 {dimension_numbers = #tpu.dot_dimension_numbers<[1], [0], [0], [1], [0, 0, 1, 1], [], []>} : vector<8x8xbf16>, vector<8x16xbf16>, vector<8x16xf32> -> vector<8x16xf32>
    %97 = tpu.reciprocal %94 {approx = true} : vector<8x1xf32> -> vector<8x1xf32>
    %98 = vector.broadcast %97 : vector<8x1xf32> to vector<8x16xf32>
    %99 = arith.mulf %96, %98 : vector<8x16xf32>
    %100 = vector.extract_strided_slice %51 {offsets = [0, 48], sizes = [8, 16], strides = [1, 1]} : vector<16x128xbf16> to vector<8x16xbf16>
    %101 = vector.extract_strided_slice %51 {offsets = [0, 112], sizes = [8, 16], strides = [1, 1]} : vector<16x128xbf16> to vector<8x16xbf16>
    %102 = vector.extract_strided_slice %5 {offsets = [0, 48], sizes = [8, 16], strides = [1, 1]} : vector<16x64xbf16> to vector<8x16xbf16>
    %cst_29 = arith.constant dense<0.000000e+00> : vector<8x8xf32>
    %103 = tpu.matmul %100, %101, %cst_29 {dimension_numbers = #tpu.dot_dimension_numbers<[1], [1], [0], [0], [0, 0, 1, 0], [], []>} : vector<8x16xbf16>, vector<8x16xbf16>, vector<8x8xf32> -> vector<8x8xf32>
    %cst_30 = arith.constant dense<0xFF800000> : vector<8xf32>
    %104 = vector.multi_reduction <maximumf>, %103, %cst_30 [1] : vector<8x8xf32> to vector<8xf32>
    %105 = vector.shape_cast %104 : vector<8xf32> to vector<8x1xf32>
    %106 = vector.broadcast %105 : vector<8x1xf32> to vector<8x8xf32>
    %107 = arith.subf %103, %106 : vector<8x8xf32>
    %108 = math.exp %107 : vector<8x8xf32>
    %cst_31 = arith.constant dense<0.000000e+00> : vector<8xf32>
    %109 = vector.multi_reduction <add>, %108, %cst_31 [1] : vector<8x8xf32> to vector<8xf32>
    %110 = vector.shape_cast %109 : vector<8xf32> to vector<8x1xf32>
    %111 = arith.truncf %108 : vector<8x8xf32> to vector<8x8xbf16>
    %cst_32 = arith.constant dense<0.000000e+00> : vector<8x16xf32>
    %112 = tpu.matmul %111, %102, %cst_32 {dimension_numbers = #tpu.dot_dimension_numbers<[1], [0], [0], [1], [0, 0, 1, 1], [], []>} : vector<8x8xbf16>, vector<8x16xbf16>, vector<8x16xf32> -> vector<8x16xf32>
    %113 = tpu.reciprocal %110 {approx = true} : vector<8x1xf32> -> vector<8x1xf32>
    %114 = vector.broadcast %113 : vector<8x1xf32> to vector<8x16xf32>
    %115 = arith.mulf %112, %114 : vector<8x16xf32>
    %116 = tpu.concatenate %67, %83, %99, %115 in 1 : vector<8x16xf32>, vector<8x16xf32>, vector<8x16xf32>, vector<8x16xf32> -> vector<8x64xf32>
    %117 = vector.extract_strided_slice %51 {offsets = [8, 0], sizes = [8, 16], strides = [1, 1]} : vector<16x128xbf16> to vector<8x16xbf16>
    %118 = vector.extract_strided_slice %51 {offsets = [8, 64], sizes = [8, 16], strides = [1, 1]} : vector<16x128xbf16> to vector<8x16xbf16>
    %119 = vector.extract_strided_slice %5 {offsets = [8, 0], sizes = [8, 16], strides = [1, 1]} : vector<16x64xbf16> to vector<8x16xbf16>
    %cst_33 = arith.constant dense<0.000000e+00> : vector<8x8xf32>
    %120 = tpu.matmul %117, %118, %cst_33 {dimension_numbers = #tpu.dot_dimension_numbers<[1], [1], [0], [0], [0, 0, 1, 0], [], []>} : vector<8x16xbf16>, vector<8x16xbf16>, vector<8x8xf32> -> vector<8x8xf32>
    %cst_34 = arith.constant dense<0xFF800000> : vector<8xf32>
    %121 = vector.multi_reduction <maximumf>, %120, %cst_34 [1] : vector<8x8xf32> to vector<8xf32>
    %122 = vector.shape_cast %121 : vector<8xf32> to vector<8x1xf32>
    %123 = vector.broadcast %122 : vector<8x1xf32> to vector<8x8xf32>
    %124 = arith.subf %120, %123 : vector<8x8xf32>
    %125 = math.exp %124 : vector<8x8xf32>
    %cst_35 = arith.constant dense<0.000000e+00> : vector<8xf32>
    %126 = vector.multi_reduction <add>, %125, %cst_35 [1] : vector<8x8xf32> to vector<8xf32>
    %127 = vector.shape_cast %126 : vector<8xf32> to vector<8x1xf32>
    %128 = arith.truncf %125 : vector<8x8xf32> to vector<8x8xbf16>
    %cst_36 = arith.constant dense<0.000000e+00> : vector<8x16xf32>
    %129 = tpu.matmul %128, %119, %cst_36 {dimension_numbers = #tpu.dot_dimension_numbers<[1], [0], [0], [1], [0, 0, 1, 1], [], []>} : vector<8x8xbf16>, vector<8x16xbf16>, vector<8x16xf32> -> vector<8x16xf32>
    %130 = tpu.reciprocal %127 {approx = true} : vector<8x1xf32> -> vector<8x1xf32>
    %131 = vector.broadcast %130 : vector<8x1xf32> to vector<8x16xf32>
    %132 = arith.mulf %129, %131 : vector<8x16xf32>
    %133 = vector.extract_strided_slice %51 {offsets = [8, 16], sizes = [8, 16], strides = [1, 1]} : vector<16x128xbf16> to vector<8x16xbf16>
    %134 = vector.extract_strided_slice %51 {offsets = [8, 80], sizes = [8, 16], strides = [1, 1]} : vector<16x128xbf16> to vector<8x16xbf16>
    %135 = vector.extract_strided_slice %5 {offsets = [8, 16], sizes = [8, 16], strides = [1, 1]} : vector<16x64xbf16> to vector<8x16xbf16>
    %cst_37 = arith.constant dense<0.000000e+00> : vector<8x8xf32>
    %136 = tpu.matmul %133, %134, %cst_37 {dimension_numbers = #tpu.dot_dimension_numbers<[1], [1], [0], [0], [0, 0, 1, 0], [], []>} : vector<8x16xbf16>, vector<8x16xbf16>, vector<8x8xf32> -> vector<8x8xf32>
    %cst_38 = arith.constant dense<0xFF800000> : vector<8xf32>
    %137 = vector.multi_reduction <maximumf>, %136, %cst_38 [1] : vector<8x8xf32> to vector<8xf32>
    %138 = vector.shape_cast %137 : vector<8xf32> to vector<8x1xf32>
    %139 = vector.broadcast %138 : vector<8x1xf32> to vector<8x8xf32>
    %140 = arith.subf %136, %139 : vector<8x8xf32>
    %141 = math.exp %140 : vector<8x8xf32>
    %cst_39 = arith.constant dense<0.000000e+00> : vector<8xf32>
    %142 = vector.multi_reduction <add>, %141, %cst_39 [1] : vector<8x8xf32> to vector<8xf32>
    %143 = vector.shape_cast %142 : vector<8xf32> to vector<8x1xf32>
    %144 = arith.truncf %141 : vector<8x8xf32> to vector<8x8xbf16>
    %cst_40 = arith.constant dense<0.000000e+00> : vector<8x16xf32>
    %145 = tpu.matmul %144, %135, %cst_40 {dimension_numbers = #tpu.dot_dimension_numbers<[1], [0], [0], [1], [0, 0, 1, 1], [], []>} : vector<8x8xbf16>, vector<8x16xbf16>, vector<8x16xf32> -> vector<8x16xf32>
    %146 = tpu.reciprocal %143 {approx = true} : vector<8x1xf32> -> vector<8x1xf32>
    %147 = vector.broadcast %146 : vector<8x1xf32> to vector<8x16xf32>
    %148 = arith.mulf %145, %147 : vector<8x16xf32>
    %149 = vector.extract_strided_slice %51 {offsets = [8, 32], sizes = [8, 16], strides = [1, 1]} : vector<16x128xbf16> to vector<8x16xbf16>
    %150 = vector.extract_strided_slice %51 {offsets = [8, 96], sizes = [8, 16], strides = [1, 1]} : vector<16x128xbf16> to vector<8x16xbf16>
    %151 = vector.extract_strided_slice %5 {offsets = [8, 32], sizes = [8, 16], strides = [1, 1]} : vector<16x64xbf16> to vector<8x16xbf16>
    %cst_41 = arith.constant dense<0.000000e+00> : vector<8x8xf32>
    %152 = tpu.matmul %149, %150, %cst_41 {dimension_numbers = #tpu.dot_dimension_numbers<[1], [1], [0], [0], [0, 0, 1, 0], [], []>} : vector<8x16xbf16>, vector<8x16xbf16>, vector<8x8xf32> -> vector<8x8xf32>
    %cst_42 = arith.constant dense<0xFF800000> : vector<8xf32>
    %153 = vector.multi_reduction <maximumf>, %152, %cst_42 [1] : vector<8x8xf32> to vector<8xf32>
    %154 = vector.shape_cast %153 : vector<8xf32> to vector<8x1xf32>
    %155 = vector.broadcast %154 : vector<8x1xf32> to vector<8x8xf32>
    %156 = arith.subf %152, %155 : vector<8x8xf32>
    %157 = math.exp %156 : vector<8x8xf32>
    %cst_43 = arith.constant dense<0.000000e+00> : vector<8xf32>
    %158 = vector.multi_reduction <add>, %157, %cst_43 [1] : vector<8x8xf32> to vector<8xf32>
    %159 = vector.shape_cast %158 : vector<8xf32> to vector<8x1xf32>
    %160 = arith.truncf %157 : vector<8x8xf32> to vector<8x8xbf16>
    %cst_44 = arith.constant dense<0.000000e+00> : vector<8x16xf32>
    %161 = tpu.matmul %160, %151, %cst_44 {dimension_numbers = #tpu.dot_dimension_numbers<[1], [0], [0], [1], [0, 0, 1, 1], [], []>} : vector<8x8xbf16>, vector<8x16xbf16>, vector<8x16xf32> -> vector<8x16xf32>
    %162 = tpu.reciprocal %159 {approx = true} : vector<8x1xf32> -> vector<8x1xf32>
    %163 = vector.broadcast %162 : vector<8x1xf32> to vector<8x16xf32>
    %164 = arith.mulf %161, %163 : vector<8x16xf32>
    %165 = vector.extract_strided_slice %51 {offsets = [8, 48], sizes = [8, 16], strides = [1, 1]} : vector<16x128xbf16> to vector<8x16xbf16>
    %166 = vector.extract_strided_slice %51 {offsets = [8, 112], sizes = [8, 16], strides = [1, 1]} : vector<16x128xbf16> to vector<8x16xbf16>
    %167 = vector.extract_strided_slice %5 {offsets = [8, 48], sizes = [8, 16], strides = [1, 1]} : vector<16x64xbf16> to vector<8x16xbf16>
    %cst_45 = arith.constant dense<0.000000e+00> : vector<8x8xf32>
    %168 = tpu.matmul %165, %166, %cst_45 {dimension_numbers = #tpu.dot_dimension_numbers<[1], [1], [0], [0], [0, 0, 1, 0], [], []>} : vector<8x16xbf16>, vector<8x16xbf16>, vector<8x8xf32> -> vector<8x8xf32>
    %cst_46 = arith.constant dense<0xFF800000> : vector<8xf32>
    %169 = vector.multi_reduction <maximumf>, %168, %cst_46 [1] : vector<8x8xf32> to vector<8xf32>
    %170 = vector.shape_cast %169 : vector<8xf32> to vector<8x1xf32>
    %171 = vector.broadcast %170 : vector<8x1xf32> to vector<8x8xf32>
    %172 = arith.subf %168, %171 : vector<8x8xf32>
    %173 = math.exp %172 : vector<8x8xf32>
    %cst_47 = arith.constant dense<0.000000e+00> : vector<8xf32>
    %174 = vector.multi_reduction <add>, %173, %cst_47 [1] : vector<8x8xf32> to vector<8xf32>
    %175 = vector.shape_cast %174 : vector<8xf32> to vector<8x1xf32>
    %176 = arith.truncf %173 : vector<8x8xf32> to vector<8x8xbf16>
    %cst_48 = arith.constant dense<0.000000e+00> : vector<8x16xf32>
    %177 = tpu.matmul %176, %167, %cst_48 {dimension_numbers = #tpu.dot_dimension_numbers<[1], [0], [0], [1], [0, 0, 1, 1], [], []>} : vector<8x8xbf16>, vector<8x16xbf16>, vector<8x16xf32> -> vector<8x16xf32>
    %178 = tpu.reciprocal %175 {approx = true} : vector<8x1xf32> -> vector<8x1xf32>
    %179 = vector.broadcast %178 : vector<8x1xf32> to vector<8x16xf32>
    %180 = arith.mulf %177, %179 : vector<8x16xf32>
    %181 = tpu.concatenate %132, %148, %164, %180 in 1 : vector<8x16xf32>, vector<8x16xf32>, vector<8x16xf32>, vector<8x16xf32> -> vector<8x64xf32>
    %182 = tpu.concatenate %116, %181 in 0 : vector<8x64xf32>, vector<8x64xf32> -> vector<16x64xf32>
    %183 = arith.truncf %182 : vector<16x64xf32> to vector<16x64xbf16>
    %c0_49 = arith.constant 0 : index
    %c0_50 = arith.constant 0 : index
    %184 = vector.load %arg6[%c0_49, %c0_50] : memref<64x64xbf16, #tpu.memory_space<vmem>>, vector<64x64xbf16>
    %cst_51 = arith.constant dense<0.000000e+00> : vector<16x64xf32>
    %185 = tpu.matmul %183, %184, %cst_51 {dimension_numbers = #tpu.dot_dimension_numbers<[1], [0], [0], [1], [0, 0, 1, 1], [], []>} : vector<16x64xbf16>, vector<64x64xbf16>, vector<16x64xf32> -> vector<16x64xf32>
    %c0_52 = arith.constant 0 : index
    %c0_53 = arith.constant 0 : index
    %186 = vector.load %arg7[%c0_52, %c0_53] : memref<1x64xf32, #tpu.memory_space<vmem>>, vector<1x64xf32>
    %187 = vector.broadcast %186 : vector<1x64xf32> to vector<16x64xf32>
    %188 = arith.addf %185, %187 : vector<16x64xf32>
    %189 = arith.truncf %188 : vector<16x64xf32> to vector<16x64xbf16>
    %c0_54 = arith.constant 0 : index
    %c0_55 = arith.constant 0 : index
    %190 = vector.load %arg8[%c0_54, %c0_55] : memref<16x64xbf16, #tpu.memory_space<vmem>>, vector<16x64xbf16>
    tpu.vector_store %arg8[%c0_54, %c0_55], %189 {strides = array<i32>} : memref<16x64xbf16, #tpu.memory_space<vmem>>, vector<16x64xbf16>,
    return
  }
}

</mosaic_0001>

<bundles_post_ra>
// kernel: tpu_custom_call.1
= control target key start
LH: loop header
LB: loop body
LE: loop exit
PB: predicated region body
PF: predicated region fallthrough
CT: control target
= control target key end

     0   :  { %13 = vsyncpa [#allocation3], 0  ;;  %s1478_s0 = inlined_call_operand.hbm [shape: bf16[16,64], index: 0, kind: input, shape index: {}]   ;;  %s1479_s1 = inlined_call_operand.hbm [shape: bf16[64,192], index: 1, kind: input, shape index: {}]   ;;  %s1480_s2 = inlined_call_operand.hbm [shape: f32[16,128], index: 2, kind: input, shape index: {}]   ;;  %s1481_s3 = inlined_call_operand.hbm [shape: f32[16,128], index: 3, kind: input, shape index: {}]   ;;  %s1482_s4 = inlined_call_operand.hbm [shape: f32[16,128], index: 4, kind: input, shape index: {}]   ;;  %s1483_s5 = inlined_call_operand.vmem [shape: f32[1,128], index: 5, kind: input, shape index: {}]   ;;  %s1484_s6 = inlined_call_operand.hbm [shape: bf16[64,64], index: 6, kind: input, shape index: {}]   ;;  %s1485_s7 = inlined_call_operand.vmem [shape: f32[1,64], index: 7, kind: input, shape index: {}]   ;;  %s1486_s8 = inlined_call_operand.hbm [shape: bf16[16,64], index: 8, kind: output, shape index: {}]  }
   0x1   :  { %14 = vsyncpa [#allocation6], 0 }
   0x2   :  { %15 = vsyncpa [#allocation9], 0 }
   0x3   :  { %16 = vsyncpa [#allocation12], 0  ;;  %s35_s29 = sshll.u32 %s1479_s1, 4  ;;  %s36_s29 = int_to_ptr.hbm [resolvable:$true] %s35_s29 }
   0x4   :  { %17 = vsyncpa [#allocation4], 0  ;;  %s1241_s30 = smov [#allocation5]   ;;  %s61_s12 = sshll.u32 %s1481_s3, 4  ;;  %s62_s12 = int_to_ptr.hbm [resolvable:$true] %s61_s12 }
   0x5   :  { %s37_s9 = sshll.u32 %s1241_s30, 4  ;;  %s1242_s13 = smov 128   ;;  %s38_s9 = int_to_ptr.vmem [resolvable:$true] %s37_s9 }
   0x6   :  { %s1243_s14 = smov 8   ;;  %s1244_s15 = smov [#allocation8]  }
   0x7   :  { %43 = dma.hbm_to_vmem [thread:$0]  %s36_s29, 1024, %s38_s9, [#allocation6], %s1242_s13, %s1242_s13, %s1243_s14  }
   0x8   :  { %s63_s16 = sshll.u32 %s1244_s15, 4  ;;  %s22_s18 = sshll.u32 %s1478_s0, 4  ;;  %s64_s16 = int_to_ptr.vmem [resolvable:$true] %s63_s16  ;;  %s23_s18 = int_to_ptr.hbm [resolvable:$true] %s22_s18 }
   0x9   :  { %69 = dma.hbm_to_vmem [thread:$0]  %s62_s12, 256, %s64_s16, [#allocation9], %s1242_s13, %s1242_s13, %s1243_s14  }
   0xa   :  { %s1245_s3 = smov [#allocation2]   ;;  %s48_s22 = sshll.u32 %s1480_s2, 4  ;;  %s49_s22 = int_to_ptr.hbm [resolvable:$true] %s48_s22 }
   0xb   :  { %s24_s19 = sshll.u32 %s1245_s3, 4  ;;  %s1246_s23 = smov 64   ;;  %s25_s19 = int_to_ptr.vmem [resolvable:$true] %s24_s19 }
   0xc   :  { %s1247_s24 = smov 4   ;;  %s1248_s0 = smov [#allocation7]  }
   0xd   :  { %30 = dma.hbm_to_vmem [thread:$0]  %s23_s18, 128, %s25_s19, [#allocation3], %s1246_s23, %s1246_s23, %s1247_s24  }
   0xe   :  { %s50_s25 = sshll.u32 %s1248_s0, 4  ;;  %s74_s28 = sshll.u32 %s1482_s4, 4  ;;  %s51_s25 = int_to_ptr.vmem [resolvable:$true] %s50_s25  ;;  %s75_s28 = int_to_ptr.hbm [resolvable:$true] %s74_s28 }
   0xf   :  { %56 = dma.hbm_to_vmem [thread:$0]  %s49_s22, 256, %s51_s25, [#allocation6], %s1242_s13, %s1242_s13, %s1243_s14  }
  0x10   :  { %s89_s30 = sshll.u32 %s1484_s6, 4  ;;  %s1249_s9 = smov [#allocation10]   ;;  %s90_s30 = int_to_ptr.hbm [resolvable:$true] %s89_s30 }
  0x11   :  { %s76_s10 = sshll.u32 %s1249_s9, 4  ;;  %s1250_s11 = smov [#allocation11]   ;;  %s77_s10 = int_to_ptr.vmem [resolvable:$true] %s76_s10 }
  0x12   :  { %82 = dma.hbm_to_vmem [thread:$0]  %s75_s28, 256, %s77_s10, [#allocation9], %s1242_s13, %s1242_s13, %s1243_s14  }
  0x13   :  { %s91_s4 = sshll.u32 %s1250_s11, 4  ;;  %s92_s4 = int_to_ptr.vmem [resolvable:$true] %s91_s4 }
  0x14   :  { %97 = dma.hbm_to_vmem [thread:$0]  %s90_s30, 512, %s92_s4, [#allocation12], %s1246_s23, %s1246_s23, %s1247_s24  }
  0x15   :  { %1231 = dma.done.wait [#allocation3], 128  }
  0x16   :  { %1232 = vsyncadd [#allocation3], 4294967168 }
  0x17   :  { %1233 = dma.done.wait [#allocation6], 1280  }
  0x18   :  { %1234 = vsyncadd [#allocation6], 4294966016 }
  0x19   :  { %1235 = dma.done.wait [#allocation9], 512  }
  0x1a   :  { %1236 = vsyncadd [#allocation9], 4294966784 }
  0x1b   :  { %1237 = dma.done.wait [#allocation12], 512  }
  0x1c   :  { %1238 = vsyncadd [#allocation12], 4294966784  ;;  %v934_v0 = vld [vmem:[#allocation5 + $0x30] sm:$0xf]  ;;  %v983_v1 = vld [vmem:[#allocation5 + $0x34] sm:$0xf0] }
  0x1d   :  { %v982_v2 = vld [vmem:[#allocation5 + $0x34] sm:$0xf]  ;;  %v935_v3 = vor.u32 %v983_v1, %v934_v0  ;;  %v936_v4 = vld [vmem:[#allocation5 + $0x38] sm:$0xf0]  ;;  %v926_v5 = vld [vmem:[#allocation5 + $0x20] sm:$0xf] }
  0x1e   :  { %v981_v6 = vld [vmem:[#allocation5 + $0x24] sm:$0xf0]  ;;  %v939_v7 = vor.u32 %v982_v2, %v936_v4  ;;  %v980_v8 = vld [vmem:[#allocation5 + $0x24] sm:$0xf]  ;;  %v928_v9 = vld [vmem:[#allocation5 + $0x28] sm:$0xf0] }
  0x1f   :  { %188 = vmatpush.bf16.msra.mxu0 %v935_v3  ;;  %v927_v10 = vor.u32 %v981_v6, %v926_v5  ;;  %v931_v11 = vor.u32 %v980_v8, %v928_v9  ;;  %v918_v12 = vld [vmem:[#allocation5 + $0x10] sm:$0xf]  ;;  %v979_v13 = vld [vmem:[#allocation5 + $0x14] sm:$0xf0]  ;;  %v978_v14 = vld [vmem:[#allocation5 + $0x14] sm:$0xf] }
  0x20   :  { %202 = vmatpush.bf16.msra.mxu1 %v939_v7  ;;  %v920_v15 = vld [vmem:[#allocation5 + $0x18] sm:$0xf0]  ;;  %v919_v16 = vor.u32 %v979_v13, %v918_v12  ;;  %v910_v18 = vld [vmem:[#allocation5] sm:$0xf]  ;;  %v977_v19 = vld [vmem:[#allocation5 + $0x4] sm:$0xf0] }
  0x21   :  { %v923_v17 = vor.u32 %v978_v14, %v920_v15  ;;  %v976_v20 = vld [vmem:[#allocation5 + $0x4] sm:$0xf]  ;;  %v912_v21 = vld [vmem:[#allocation5 + $0x8] sm:$0xf0]  ;;  %v911_v22 = vor.u32 %v977_v19, %v910_v18  ;;  %v975_v24 = vld [vmem:[#allocation2] sm:$0xff]  ;;  %vm180_vm0 = vcmask 523264  }
  0x22   :  { %v915_v23 = vor.u32 %v976_v20, %v912_v21  ;;  %vm378_vm1 = vcmask 1043456   ;;  %s1251_s6 = smov 120   ;;  %v224_v37 = vld [vmem:[#allocation8] sm:$0xff]  ;;  %v235_v38 = vld [vmem:[#allocation10] sm:$0xff]  ;;  %v225_v50 = vld [vmem:[#allocation8 + $0x8] sm:$0xff]  ;;  %s1253_s15 = smov 16  }
  0x23   :  { %189 = vmatpush.bf16.msra.mxu0 %v927_v10  ;;  %v241_v40 = vld [vmem:[#allocation7] sm:$0xff]  ;;  %v236_v51 = vld [vmem:[#allocation10 + $0x8] sm:$0xff]  ;;  %vm342_vm8 = vcmask 130048   ;;  %s1255_s16 = smov 80   ;;  %s1256_s17 = smov 32   ;;  %vm234_vm15 = vcmask 64512  }
  0x24   :  { %203 = vmatpush.bf16.msra.mxu1 %v931_v11  ;;  %v242_v53 = vld [vmem:[#allocation7 + $0x8] sm:$0xff]  ;;  %s1257_s1 = smov 96   ;;  %s1258_s19 = smov [#allocation13]  }
  0x25   :  { %s886_s20 = sshll.u32 %s1258_s19, 4  ;;  %s888_s0 = sshll.u32 %s1486_s8, 4  ;;  %s887_s20 = int_to_ptr.vmem [resolvable:$true] %s886_s20  ;;  %s889_s0 = int_to_ptr.hbm [resolvable:$true] %s888_s0 }
  0x27   :  { %190 = vmatpush.bf16.msra.mxu0 %v919_v16 }
  0x28   :  { %204 = vmatpush.bf16.msra.mxu1 %v923_v17 }
  0x2b   :  { %191 = vmatpush.bf16.msra.mxu0 %v911_v22 }
  0x2c   :  { %205 = vmatpush.bf16.msra.mxu1 %v915_v23 }
  0x2e   :  { %940 = vmatmul.msk.bf16.vlgmr.msra.gmra.mxu0 %vm180_vm0, %v975_v24 }
  0x2f   :  { %941 = vmatmul.msk.bf16.vlgmr.msra.gmra.mxu1 %vm180_vm0, %v975_v24 }
  0xab   :  { %v193_v25 = vpop.f32.mrf.mxu0 }
  0xac   :  { %v207_v26 = vpop.f32.mrf.mxu1 }
  0xad   :  { %v212_v27 = vpack.c.bf16 %v207_v26, %v193_v25  ;;  %v1021_v25 = vld [vmem:[%s1483_s5] ss:$0 sm:$0xff]  ;;  %s1254_s5 = smov 112  }
  0xaf   :  { %v214_v28 = vunpack.c.l.bf16 %v212_v27  ;;  %v373_v29 = vunpack.c.h.b16 %v212_v27 }
  0xb1   :  { %v1342_v30 = vpack.c.b16 %v373_v29, %v373_v29  ;;  %218 = vrot.lane.b32.xlu0 %v214_v28, %s1251_s6  ;;  %v243_v44 = vmul.f32 %v241_v40, %v214_v28 }
  0xb3   :  { %v380_v31 = vsel %vm378_vm1, %v1342_v30, 0  ;;  %v195_v32 = vpop.f32.mrf.mxu0 }
  0xb4   :  { %389 = vmatpush.bf16.msra.mxu3 %v380_v31  ;;  %v209_v33 = vpop.f32.mrf.mxu1 }
  0xb5   :  { %v1347_v34 = vpack.c.bf16 %v209_v33, %v195_v32 }
  0xb7   :  { %v215_v35 = vunpack.c.l.bf16 %v1347_v34 }
  0xb9   :  { %228 = vrot.lane.b32.xlu0 %v214_v28, %s1243_s14  ;;  %v244_v57 = vmul.f32 %v242_v53, %v215_v35 }
  0xc1   :  { %220 = vrot.lane.b32.xlu0 %v215_v35, %s1251_s6 }
  0xc9   :  { %230 = vrot.lane.b32.xlu0 %v215_v35, %s1243_s14  ;;  %s1252_s14 = smov 48  }
 0x123   :  { %v219_v36 = vpop.permute.xlu0 %218 }
 0x124   :  { %v226_v41 = vmul.f32 %v224_v37, %v219_v36 }
 0x12b   :  { %v229_v39 = vpop.permute.xlu0 %228 }
 0x12c   :  { %v237_v42 = vmul.f32 %v235_v38, %v229_v39 }
 0x12e   :  { %v239_v43 = vadd.f32 %v237_v42, %v226_v41 }
 0x130   :  { %v245_v45 = vadd.f32 %v243_v44, %v239_v43 }
 0x132   :  { %v247_v46 = vpack.c.bf16 %v245_v45, %v245_v45 }
 0x133   :  { %v221_v47 = vpop.permute.xlu0 %220 }
 0x134   :  { %v249_v48 = vunpack.c.l.bf16 %v247_v46  ;;  %v227_v54 = vmul.f32 %v225_v50, %v221_v47 }
 0x136   :  { %v251_v49 = vmul.f32 %v249_v48, %v249_v48 }
 0x138   :  { %285 = vrot.lane.b32.xlu1 %v251_v49, %s1246_s23  ;;  %v253_v62 = vsel %vm180_vm0, %v251_v49, 0.0 }
 0x13b   :  { %v231_v52 = vpop.permute.xlu0 %230 }
 0x13c   :  { %v238_v55 = vmul.f32 %v236_v51, %v231_v52 }
 0x13e   :  { %v240_v56 = vadd.f32 %v238_v55, %v227_v54 }
 0x140   :  { %v246_v58 = vadd.f32 %v244_v57, %v240_v56 }
 0x142   :  { %v248_v59 = vpack.c.bf16 %v246_v58, %v246_v58 }
 0x144   :  { %v1352_v60 = vunpack.c.l.bf16 %v248_v59 }
 0x146   :  { %v252_v61 = vmul.f32 %v1352_v60, %v1352_v60 }
 0x148   :  { %287 = vrot.lane.b32.xlu0 %v252_v61, %s1246_s23  ;;  %v256_v33 = vsel %vm180_vm0, %v252_v61, 0.0 }
 0x162   :  { %254 = vadd.xlane.f32.xlu1 %v253_v62 }
 0x1aa   :  { %v286_v63 = vpop.permute.xlu1 %285 }
 0x1ab   :  { %v291_v0 = vsel %vm180_vm0, %v286_v63, 0.0 }
 0x1ac   :  { %292 = vadd.xlane.f32.xlu2 %v291_v0 }
 0x1ba   :  { %v288_v1 = vpop.permute.xlu0 %287 }
 0x1bb   :  { %v294_v2 = vsel %vm180_vm0, %v288_v1, 0.0 }
 0x1bc   :  { %295 = vadd.xlane.f32.xlu0 %v294_v2 }
 0x1d5   :  { %v255_v3 = vpop.xlane.xlu1 %254 }
 0x1d6   :  { %v259_v4 = vmul.f32 0.015625, %v255_v3 }
 0x1d8   :  { %v261_v5 = vadd.f32 1e-06, %v259_v4 }
 0x1da   :  { %1023 = vrsqrt.f32 %v261_v5  ;;  %vm269_vm4 = vweird.f32 %v261_v5 }
 0x1e0   :  { %v1024_v6 = vpop.eup %1023 }
 0x1e1   :  { %v264_v9 = vmul.f32 %v1024_v6, %v261_v5  ;;  %vm270_vm2 = vweird.f32 %v1024_v6 }
 0x1e2   :  { %vm271_vm5 = vmor %vm269_vm4, %vm270_vm2  ;;  %vm580_vm2 = vcmask 392192  }
 0x1e3   :  { %v265_v11 = vmul.f32 %v1024_v6, %v264_v9 }
 0x1e5   :  { %v266_v12 = vmul.f32 0.5, %v265_v11 }
 0x1e7   :  { %v267_v15 = vsub.f32 1.5, %v266_v12 }
 0x1e9   :  { %v268_v18 = vmul.f32 %v1024_v6, %v267_v15 }
 0x1eb   :  { %v272_v21 = vsel %vm271_vm5, %v1024_v6, %v268_v18 }
 0x21f   :  { %v293_v7 = vpop.xlane.xlu2 %292 }
 0x220   :  { %v297_v8 = vmul.f32 0.015625, %v293_v7 }
 0x222   :  { %v299_v10 = vadd.f32 1e-06, %v297_v8 }
 0x224   :  { %1025 = vrsqrt.f32 %v299_v10  ;;  %vm307_vm6 = vweird.f32 %v299_v10 }
 0x22a   :  { %v1026_v13 = vpop.eup %1025 }
 0x22b   :  { %v302_v14 = vmul.f32 %v1026_v13, %v299_v10  ;;  %vm308_vm3 = vweird.f32 %v1026_v13 }
 0x22c   :  { %vm309_vm7 = vmor %vm307_vm6, %vm308_vm3  ;;  %vm879_vm3 = vcmask 519168  }
 0x22d   :  { %v303_v16 = vmul.f32 %v1026_v13, %v302_v14 }
 0x22f   :  { %v304_v17 = vmul.f32 0.5, %v303_v16  ;;  %v296_v39 = vpop.xlane.xlu0 %295 }
 0x230   :  { %v298_v40 = vmul.f32 0.015625, %v296_v39 }
 0x231   :  { %v305_v19 = vsub.f32 1.5, %v304_v17 }
 0x232   :  { %v300_v41 = vadd.f32 1e-06, %v298_v40 }
 0x233   :  { %v306_v20 = vmul.f32 %v1026_v13, %v305_v19 }
 0x234   :  { %1027 = vrsqrt.f32 %v300_v41  ;;  %vm317_vm11 = vweird.f32 %v300_v41 }
 0x235   :  { %v310_v22 = vsel %vm309_vm7, %v1026_v13, %v306_v20 }
 0x236   :  { %v321_v23 = vsel %vm180_vm0, %v272_v21, %v310_v22 }
 0x237   :  { %v323_v24 = vmul.f32 %v321_v23, %v249_v48 }
 0x239   :  { %v325_v26 = vpack.c.bf16 %v323_v24, %v323_v24 }
 0x23a   :  { %v1028_v42 = vpop.eup %1027 }
 0x23b   :  { %v328_v27 = vunpack.c.l.bf16 %v325_v26  ;;  %v312_v45 = vmul.f32 %v1028_v42, %v300_v41  ;;  %vm318_vm9 = vweird.f32 %v1028_v42 }
 0x23c   :  { %vm319_vm12 = vmor %vm317_vm11, %vm318_vm9 }
 0x23d   :  { %v333_v28 = vmul.f32 %v1021_v25, %v328_v27  ;;  %v313_v47 = vmul.f32 %v1028_v42, %v312_v45 }
 0x23f   :  { %v335_v29 = vpack.c.bf16 %v333_v28, %v333_v28  ;;  %v314_v48 = vmul.f32 0.5, %v313_v47 }
 0x241   :  { %v338_v31 = vunpack.c.l.b16 %v335_v29  ;;  %v315_v51 = vsub.f32 1.5, %v314_v48 }
 0x243   :  { %v1364_v32 = vpack.c.b16 %v338_v31, %v338_v31  ;;  %v316_v54 = vmul.f32 %v1028_v42, %v315_v51 }
 0x245   :  { %399 = vrot.lane.b32.xlu1 %v1364_v32, %s1252_s14  ;;  %340 = vrot.lane.b32.xlu2 %v1364_v32, %s1246_s23  ;;  %v320_v57 = vsel %vm319_vm12, %v1028_v42, %v316_v54 }
 0x246   :  { %511 = vrot.lane.b32.xlu0 %v1364_v32, %s1253_s15 }
 0x26e   :  { %257 = vadd.xlane.f32.xlu2 %v256_v33  ;;  %v617_v33 = vunpack.c.h.b16 %v1347_v34 }
 0x286   :  { %397 = vrot.lane.b32.xlu2 %v1364_v32, %s1254_s5 }
 0x29f   :  { %v341_v35 = vpop.permute.xlu2 %340 }
 0x2a0   :  { %v347_v36 = vsel %vm342_vm8, %v341_v35, 0  ;;  %v618_v35 = vpack.c.b16 %v617_v33, %v617_v33 }
 0x2a1   :  { %356 = vmatpush.bf16.xpose.msra.mxu2 %v347_v36 }
 0x2a8   :  { %942 = vmatmul.msk.bf16.vlgmr.msra.gmra.mxu2 %vm342_vm8, %v335_v29 }
 0x2b7   :  { %v400_v37 = vpop.permute.xlu1 %399 }
 0x2b8   :  { %v405_v38 = vsel %vm342_vm8, %v400_v37, 0  ;;  %v512_v9 = vpop.permute.xlu0 %511 }
 0x2b9   :  { %414 = vmatpush.bf16.xpose.msrb.mxu3 %v405_v38  ;;  %v517_v21 = vsel %vm342_vm8, %v512_v9, 0  ;;  %v623_v38 = vsel %vm378_vm1, %v618_v35, 0 }
 0x2e1   :  { %v258_v43 = vpop.xlane.xlu2 %257 }
 0x2e2   :  { %v260_v44 = vmul.f32 0.015625, %v258_v43 }
 0x2e4   :  { %v262_v46 = vadd.f32 1e-06, %v260_v44 }
 0x2e6   :  { %1029 = vrsqrt.f32 %v262_v46  ;;  %vm279_vm13 = vweird.f32 %v262_v46 }
 0x2e9   :  { %v398_v6 = vpop.permute.xlu2 %397 }
 0x2ec   :  { %v1030_v49 = vpop.eup %1029 }
 0x2ed   :  { %v274_v50 = vmul.f32 %v1030_v49, %v262_v46  ;;  %vm280_vm10 = vweird.f32 %v1030_v49 }
 0x2ee   :  { %vm281_vm14 = vmor %vm279_vm13, %vm280_vm10 }
 0x2ef   :  { %v275_v52 = vmul.f32 %v1030_v49, %v274_v50 }
 0x2f1   :  { %v276_v53 = vmul.f32 0.5, %v275_v52 }
 0x2f3   :  { %v277_v55 = vsub.f32 1.5, %v276_v53 }
 0x2f5   :  { %v278_v56 = vmul.f32 %v1030_v49, %v277_v55 }
 0x2f7   :  { %v282_v58 = vsel %vm281_vm14, %v1030_v49, %v278_v56 }
 0x2f8   :  { %v322_v59 = vsel %vm180_vm0, %v282_v58, %v320_v57 }
 0x2f9   :  { %v324_v61 = vmul.f32 %v322_v59, %v1352_v60 }
 0x2fb   :  { %v326_v62 = vpack.c.bf16 %v324_v61, %v324_v61 }
 0x2fd   :  { %v329_v63 = vunpack.c.l.bf16 %v326_v62 }
 0x2ff   :  { %v334_v0 = vmul.f32 %v1021_v25, %v329_v63 }
 0x301   :  { %v1380_v1 = vpack.c.bf16 %v334_v0, %v334_v0 }
 0x303   :  { %v583_v2 = vunpack.c.l.b16 %v1380_v1 }
 0x305   :  { %v584_v3 = vpack.c.b16 %v583_v2, %v583_v2 }
 0x307   :  { %640 = vrot.lane.b32.xlu0 %v584_v3, %s1254_s5  ;;  %642 = vrot.lane.b32.xlu2 %v584_v3, %s1252_s14 }
 0x30f   :  { %752 = vrot.lane.b32.xlu0 %v584_v3, %s1255_s16  ;;  %585 = vrot.lane.b32.xlu2 %v584_v3, %s1246_s23 }
 0x317   :  { %542 = vrot.lane.b32.xlu0 %v1342_v30, %s1255_s16  ;;  %698 = vrot.lane.b32.xlu2 %v584_v3, %s1256_s17 }
 0x31f   :  { %430 = vrot.lane.b32.xlu2 %v1342_v30, %s1254_s5 }
 0x32b   :  { %v358_v60 = vpop.f32.mrf.mxu2 }
 0x32c   :  { %v362_v4 = vsel %vm234_vm15, %v358_v60, -inf }
 0x32d   :  { %363 = vmax.xlane.f32.xlu1 %v362_v4 }
 0x333   :  { %v360_v5 = vpop.f32.mrf.mxu2 }
 0x346   :  { %509 = vrot.lane.b32.xlu1 %v1364_v32, %s1255_s16 }
 0x34e   :  { %455 = vrot.lane.b32.xlu1 %v1364_v32, %s1256_s17 }
 0x356   :  { %453 = vrot.lane.b32.xlu1 %v1364_v32, %s1257_s1 }
 0x35e   :  { %754 = vrot.lane.b32.xlu1 %v584_v3, %s1253_s15 }
 0x361   :  { %v643_v7 = vpop.permute.xlu2 %642 }
 0x362   :  { %v648_v23 = vsel %vm342_vm8, %v643_v7, 0 }
 0x366   :  { %696 = vrot.lane.b32.xlu1 %v584_v3, %s1257_s1 }
 0x369   :  { %v586_v8 = vpop.permute.xlu2 %585 }
 0x36a   :  { %v591_v26 = vsel %vm342_vm8, %v586_v8, 0 }
 0x36e   :  { %486 = vrot.lane.b32.xlu1 %v1342_v30, %s1257_s1 }
 0x371   :  { %v699_v10 = vpop.permute.xlu2 %698 }
 0x372   :  { %v704_v28 = vsel %vm342_vm8, %v699_v10, 0 }
 0x379   :  { %v641_v11 = vpop.permute.xlu0 %640  ;;  %v431_v12 = vpop.permute.xlu2 %430 }
 0x37a   :  { %v436_v13 = vsel %vm378_vm1, %v431_v12, 0 }
 0x37b   :  { %445 = vmatpush.bf16.msrb.mxu2 %v436_v13 }
 0x381   :  { %v753_v14 = vpop.permute.xlu0 %752 }
 0x389   :  { %v543_v15 = vpop.permute.xlu0 %542 }
 0x38a   :  { %v548_v16 = vsel %vm378_vm1, %v543_v15, 0 }
 0x38b   :  { %557 = vmatpush.bf16.msra.mxu2 %v548_v16 }
 0x3a0   :  { %v364_v17 = vpop.xlane.xlu1 %363 }
 0x3a1   :  { %v365_v18 = vsub.f32 %v358_v60, %v364_v17 }
 0x3a3   :  { %v366_v19 = vmul.f32 1.442695, %v365_v18 }
 0x3a5   :  { %1031 = vpow2.f32 %v366_v19 }
 0x3ab   :  { %v1405_v20 = vpop.eup %1031 }
 0x3ac   :  { %v371_v30 = vpack.c.bf16 %v1405_v20, %v1405_v20 }
 0x3ae   :  { %943 = vmatmul.msk.bf16.vlgmr.msra.gmra.mxu3 %vm234_vm15, %v371_v30 }
 0x3af   :  { %526 = vmatpush.bf16.xpose.msra.mxu3 %v517_v21 }
 0x3b8   :  { %v510_v22 = vpop.permute.xlu1 %509 }
 0x3be   :  { %944 = vmatmul.msk.bf16.vlgmr.msrb.gmra.mxu3 %vm342_vm8, %v398_v6 }
 0x3bf   :  { %657 = vmatpush.bf16.xpose.msrb.mxu3 %v648_v23 }
 0x3c0   :  { %v456_v24 = vpop.permute.xlu1 %455 }
 0x3c1   :  { %v461_v25 = vsel %vm342_vm8, %v456_v24, 0 }
 0x3c2   :  { %470 = vmatpush.bf16.xpose.msrb.mxu0 %v461_v25  ;;  %v368_v25 = vsel %vm234_vm15, %v1405_v20, 0.0 }
 0x3c8   :  { %v454_v27 = vpop.permute.xlu1 %453 }
 0x3c9   :  { %946 = vmatmul.msk.bf16.vlgmr.msrb.gmra.mxu0 %vm342_vm8, %v454_v27 }
 0x3ca   :  { %600 = vmatpush.bf16.xpose.msra.mxu0 %v591_v26 }
 0x3ce   :  { %948 = vmatmul.msk.bf16.vlgmr.msra.gmra.mxu3 %vm342_vm8, %v510_v22 }
 0x3d0   :  { %v755_v29 = vpop.permute.xlu1 %754 }
 0x3d1   :  { %v760_v31 = vsel %vm342_vm8, %v755_v29, 0 }
 0x3d2   :  { %713 = vmatpush.bf16.xpose.msrb.mxu0 %v704_v28  ;;  %769 = vmatpush.bf16.xpose.msra.mxu3 %v760_v31 }
 0x3d8   :  { %v697_v32 = vpop.permute.xlu1 %696 }
 0x3d9   :  { %950 = vmatmul.msk.bf16.vlgmr.msra.gmra.mxu0 %vm342_vm8, %v1380_v1 }
 0x3de   :  { %952 = vmatmul.msk.bf16.vlgmr.msrb.gmra.mxu3 %vm342_vm8, %v641_v11 }
 0x3e0   :  { %v487_v36 = vpop.permute.xlu1 %486 }
 0x3e1   :  { %v492_v37 = vsel %vm378_vm1, %v487_v36, 0 }
 0x3e2   :  { %501 = vmatpush.bf16.msrb.mxu1 %v492_v37 }
 0x3e6   :  { %632 = vmatpush.bf16.msra.mxu1 %v623_v38 }
 0x3e9   :  { %954 = vmatmul.msk.bf16.vlgmr.msrb.gmra.mxu0 %vm342_vm8, %v697_v32 }
 0x3ee   :  { %956 = vmatmul.msk.bf16.vlgmr.msra.gmra.mxu3 %vm342_vm8, %v753_v14 }
 0x431   :  { %v1427_v39 = vpop.f32.mrf.mxu3 }
 0x439   :  { %v393_v40 = vpop.f32.mrf.mxu3 }
 0x441   :  { %v416_v41 = vpop.f32.mrf.mxu3 }
 0x442   :  { %v420_v34 = vsel %vm234_vm15, %v416_v41, -inf }
 0x443   :  { %421 = vmax.xlane.f32.xlu0 %v420_v34 }
 0x446   :  { %v472_v42 = vpop.f32.mrf.mxu0 }
 0x447   :  { %v476_v43 = vsel %vm234_vm15, %v472_v42, -inf }
 0x448   :  { %477 = vmax.xlane.f32.xlu2 %v476_v43 }
 0x449   :  { %v418_v44 = vpop.f32.mrf.mxu3 }
 0x44e   :  { %v474_v45 = vpop.f32.mrf.mxu0 }
 0x451   :  { %v528_v46 = vpop.f32.mrf.mxu3 }
 0x452   :  { %v532_v47 = vsel %vm234_vm15, %v528_v46, -inf }
 0x453   :  { %533 = vmax.xlane.f32.xlu1 %v532_v47 }
 0x456   :  { %v602_v48 = vpop.f32.mrf.mxu0 }
 0x457   :  { %673 = vrot.lane.b32.xlu0 %v618_v35, %s1254_s5  ;;  %v606_v49 = vsel %vm234_vm15, %v602_v48, -inf }
 0x458   :  { %607 = vmax.xlane.f32.xlu2 %v606_v49 }
 0x459   :  { %v530_v50 = vpop.f32.mrf.mxu3 }
 0x45e   :  { %v604_v51 = vpop.f32.mrf.mxu0 }
 0x461   :  { %v659_v52 = vpop.f32.mrf.mxu3 }
 0x462   :  { %v663_v53 = vsel %vm234_vm15, %v659_v52, -inf }
 0x463   :  { %664 = vmax.xlane.f32.xlu2 %v663_v53 }
 0x466   :  { %v1435_v54 = vpop.f32.mrf.mxu0 }
 0x467   :  { %v719_v61 = vsel %vm234_vm15, %v1435_v54, -inf }
 0x469   :  { %v661_v55 = vpop.f32.mrf.mxu3 }
 0x46c   :  { %785 = vrot.lane.b32.xlu1 %v618_v35, %s1255_s16 }
 0x46e   :  { %v717_v56 = vpop.f32.mrf.mxu0 }
 0x471   :  { %v771_v57 = vpop.f32.mrf.mxu3 }
 0x472   :  { %v775_v58 = vsel %vm234_vm15, %v771_v57, -inf }
 0x473   :  { %776 = vmax.xlane.f32.xlu2 %v775_v58 }
 0x479   :  { %v773_v59 = vpop.f32.mrf.mxu3 }
 0x481   :  { %720 = vmax.xlane.f32.xlu0 %v719_v61 }
 0x48b   :  { %729 = vrot.lane.b32.xlu2 %v618_v35, %s1257_s1 }
 0x4b6   :  { %v422_v62 = vpop.xlane.xlu0 %421 }
 0x4b7   :  { %v423_v63 = vsub.f32 %v416_v41, %v422_v62 }
 0x4b9   :  { %v424_v0 = vmul.f32 1.442695, %v423_v63 }
 0x4bb   :  { %1033 = vpow2.f32 %v424_v0  ;;  %v478_v1 = vpop.xlane.xlu2 %477 }
 0x4bc   :  { %v479_v2 = vsub.f32 %v472_v42, %v478_v1 }
 0x4be   :  { %v480_v3 = vmul.f32 1.442695, %v479_v2 }
 0x4c0   :  { %1035 = vpow2.f32 %v480_v3 }
 0x4c1   :  { %v1034_v60 = vpop.eup %1033 }
 0x4c2   :  { %v426_v4 = vsel %vm234_vm15, %v1034_v60, 0.0  ;;  %v429_v5 = vpack.c.bf16 %v1034_v60, %v1034_v60 }
 0x4c3   :  { %427 = vadd.xlane.f32.xlu1 %v426_v4 }
 0x4c4   :  { %945 = vmatmul.msk.bf16.vlgmr.msrb.gmra.mxu2 %vm234_vm15, %v429_v5 }
 0x4c6   :  { %v1036_v6 = vpop.eup %1035  ;;  %v534_v7 = vpop.xlane.xlu1 %533 }
 0x4c7   :  { %v535_v8 = vsub.f32 %v528_v46, %v534_v7  ;;  %v482_v9 = vsel %vm234_vm15, %v1036_v6, 0.0  ;;  %v485_v10 = vpack.c.bf16 %v1036_v6, %v1036_v6 }
 0x4c8   :  { %483 = vadd.xlane.f32.xlu0 %v482_v9 }
 0x4c9   :  { %v536_v11 = vmul.f32 1.442695, %v535_v8  ;;  %v674_v12 = vpop.permute.xlu0 %673  ;;  %947 = vmatmul.msk.bf16.vlgmr.msrb.gmra.mxu1 %vm234_vm15, %v485_v10 }
 0x4ca   :  { %v679_v13 = vsel %vm378_vm1, %v674_v12, 0 }
 0x4cb   :  { %1037 = vpow2.f32 %v536_v11  ;;  %688 = vmatpush.bf16.msrb.mxu2 %v679_v13  ;;  %v608_v14 = vpop.xlane.xlu2 %607 }
 0x4cc   :  { %v609_v15 = vsub.f32 %v602_v48, %v608_v14 }
 0x4ce   :  { %v610_v16 = vmul.f32 1.442695, %v609_v15 }
 0x4d0   :  { %1039 = vpow2.f32 %v610_v16 }
 0x4d1   :  { %v1038_v17 = vpop.eup %1037 }
 0x4d2   :  { %v541_v18 = vpack.c.bf16 %v1038_v17, %v1038_v17  ;;  %v538_v19 = vsel %vm234_vm15, %v1038_v17, 0.0 }
 0x4d3   :  { %539 = vadd.xlane.f32.xlu1 %v538_v19  ;;  %v986_v19 = vld [vmem:[#allocation11 + $0x10] sm:$0xff] }
 0x4d4   :  { %949 = vmatmul.msk.bf16.vlgmr.msra.gmra.mxu2 %vm234_vm15, %v541_v18  ;;  %v987_v18 = vld [vmem:[#allocation11 + $0x18] sm:$0xff] }
 0x4d5   :  { %867 = vmatpush.bf16.msra.mxu0 %v987_v18 }
 0x4d6   :  { %v1040_v30 = vpop.eup %1039  ;;  %v665_v21 = vpop.xlane.xlu2 %664 }
 0x4d7   :  { %v615_v22 = vpack.c.bf16 %v1040_v30, %v1040_v30  ;;  %v666_v23 = vsub.f32 %v659_v52, %v665_v21  ;;  %v612_v46 = vsel %vm234_vm15, %v1040_v30, 0.0  ;;  %v985_v30 = vld [vmem:[#allocation11 + $0x8] sm:$0xff]  ;;  %v984_v21 = vld [vmem:[#allocation11] sm:$0xff] }
 0x4d9   :  { %v667_v24 = vmul.f32 1.442695, %v666_v23  ;;  %951 = vmatmul.msk.bf16.vlgmr.msra.gmra.mxu1 %vm234_vm15, %v615_v22  ;;  %868 = vmatpush.bf16.msra.mxu0 %v986_v19 }
 0x4db   :  { %1041 = vpow2.f32 %v667_v24  ;;  %369 = vadd.xlane.f32.xlu1 %v368_v25 }
 0x4dd   :  { %869 = vmatpush.bf16.msra.mxu0 %v985_v30 }
 0x4de   :  { %v786_v26 = vpop.permute.xlu1 %785 }
 0x4df   :  { %v791_v27 = vsel %vm378_vm1, %v786_v26, 0 }
 0x4e0   :  { %800 = vmatpush.bf16.msra.mxu2 %v791_v27 }
 0x4e1   :  { %v1042_v28 = vpop.eup %1041  ;;  %870 = vmatpush.bf16.msra.mxu0 %v984_v21 }
 0x4e2   :  { %v672_v29 = vpack.c.bf16 %v1042_v28, %v1042_v28  ;;  %v669_v31 = vsel %vm234_vm15, %v1042_v28, 0.0 }
 0x4e3   :  { %670 = vadd.xlane.f32.xlu2 %v669_v31 }
 0x4e4   :  { %953 = vmatmul.msk.bf16.vlgmr.msrb.gmra.mxu2 %vm234_vm15, %v672_v29 }
 0x4e6   :  { %v777_v32 = vpop.xlane.xlu2 %776 }
 0x4e7   :  { %v778_v33 = vsub.f32 %v771_v57, %v777_v32 }
 0x4e9   :  { %v779_v35 = vmul.f32 1.442695, %v778_v33 }
 0x4eb   :  { %1043 = vpow2.f32 %v779_v35 }
 0x4ee   :  { %v730_v36 = vpop.permute.xlu2 %729 }
 0x4ef   :  { %v735_v20 = vsel %vm378_vm1, %v730_v36, 0  ;;  %vm578_vm1 = vcmask 261120  }
 0x4f0   :  { %744 = vmatpush.bf16.msrb.mxu1 %v735_v20 }
 0x4f1   :  { %v1044_v37 = vpop.eup %1043 }
 0x4f2   :  { %v784_v38 = vpack.c.bf16 %v1044_v37, %v1044_v37  ;;  %v781_v45 = vsel %vm234_vm15, %v1044_v37, 0.0 }
 0x4f4   :  { %v721_v40 = vpop.xlane.xlu0 %720  ;;  %957 = vmatmul.msk.bf16.vlgmr.msra.gmra.mxu2 %vm234_vm15, %v784_v38 }
 0x4f5   :  { %v722_v41 = vsub.f32 %v1435_v54, %v721_v40 }
 0x4f7   :  { %v723_v34 = vmul.f32 1.442695, %v722_v41 }
 0x4f9   :  { %1045 = vpow2.f32 %v723_v34 }
 0x4ff   :  { %v1046_v42 = vpop.eup %1045 }
 0x500   :  { %v728_v43 = vpack.c.bf16 %v1046_v42, %v1046_v42  ;;  %v725_v44 = vsel %vm234_vm15, %v1046_v42, 0.0 }
 0x501   :  { %726 = vadd.xlane.f32.xlu0 %v725_v44 }
 0x502   :  { %955 = vmatmul.msk.bf16.vlgmr.msrb.gmra.mxu1 %vm234_vm15, %v728_v43 }
 0x509   :  { %782 = vadd.xlane.f32.xlu0 %v781_v45 }
 0x511   :  { %613 = vadd.xlane.f32.xlu0 %v612_v46 }
 0x536   :  { %v428_v53 = vpop.xlane.xlu1 %427 }
 0x537   :  { %1047 = vrcp.f32 %v428_v53 }
 0x53b   :  { %v484_v0 = vpop.xlane.xlu0 %483 }
 0x53d   :  { %v1048_v57 = vpop.eup %1047 }
 0x546   :  { %v503_v47 = vpop.f32.mrf.mxu1  ;;  %v540_v60 = vpop.xlane.xlu1 %539 }
 0x547   :  { %v447_v48 = vpop.f32.mrf.mxu2 }
 0x548   :  { %v452_v61 = vmul.f32 %v1048_v57, %v447_v48 }
 0x54e   :  { %v505_v49 = vpop.f32.mrf.mxu1  ;;  %v370_v22 = vpop.xlane.xlu1 %369 }
 0x54f   :  { %v449_v50 = vpop.f32.mrf.mxu2 }
 0x556   :  { %v634_v51 = vpop.f32.mrf.mxu1  ;;  %v671_v54 = vpop.xlane.xlu2 %670 }
 0x557   :  { %v559_v52 = vpop.f32.mrf.mxu2  ;;  %1049 = vrcp.f32 %v671_v54 }
 0x558   :  { %1051 = vrcp.f32 %v484_v0 }
 0x55d   :  { %v1050_v58 = vpop.eup %1049 }
 0x55e   :  { %v636_v55 = vpop.f32.mrf.mxu1  ;;  %v1052_v5 = vpop.eup %1051 }
 0x55f   :  { %v561_v56 = vpop.f32.mrf.mxu2  ;;  %v508_v9 = vmul.f32 %v1052_v5, %v503_v47 }
 0x567   :  { %v690_v59 = vpop.f32.mrf.mxu2 }
 0x568   :  { %v695_v62 = vmul.f32 %v1050_v58, %v690_v59 }
 0x56a   :  { %v1006_v63 = vpack.i.bf16 %v695_v62, %v452_v61 }
 0x56c   :  { %1007 = vrot.lane.b32.xlu1 %v1006_v63, %s1253_s15 }
 0x56f   :  { %v692_v1 = vpop.f32.mrf.mxu2 }
 0x574   :  { %v727_v2 = vpop.xlane.xlu0 %726 }
 0x575   :  { %1053 = vrcp.f32 %v727_v2 }
 0x576   :  { %1055 = vrcp.f32 %v540_v60 }
 0x577   :  { %v802_v3 = vpop.f32.mrf.mxu2 }
 0x57b   :  { %v1054_v6 = vpop.eup %1053 }
 0x57c   :  { %v783_v4 = vpop.xlane.xlu0 %782  ;;  %v1056_v11 = vpop.eup %1055 }
 0x57d   :  { %1057 = vrcp.f32 %v783_v4  ;;  %v564_v14 = vmul.f32 %v1056_v11, %v559_v52 }
 0x57e   :  { %1059 = vrcp.f32 %v370_v22 }
 0x57f   :  { %v746_v7 = vpop.f32.mrf.mxu1  ;;  %v804_v8 = vpop.f32.mrf.mxu2 }
 0x580   :  { %v751_v10 = vmul.f32 %v1054_v6, %v746_v7 }
 0x582   :  { %v1011_v12 = vpack.i.bf16 %v751_v10, %v508_v9 }
 0x583   :  { %v1058_v13 = vpop.eup %1057 }
 0x584   :  { %1012 = vrot.lane.b32.xlu2 %v1011_v12, %s1256_s17  ;;  %v807_v15 = vmul.f32 %v1058_v13, %v802_v3  ;;  %v614_v23 = vpop.xlane.xlu0 %613  ;;  %v1060_v25 = vpop.eup %1059 }
 0x585   :  { %1061 = vrcp.f32 %v614_v23  ;;  %v396_v31 = vmul.f32 %v1060_v25, %v1427_v39  ;;  %v1022_v39 = vld [vmem:[%s1485_s7] ss:$0 sm:$0xff] }
 0x586   :  { %v1016_v16 = vpack.i.bf16 %v807_v15, %v564_v14 }
 0x587   :  { %v748_v17 = vpop.f32.mrf.mxu1 }
 0x588   :  { %1017 = vrot.lane.b32.xlu0 %v1016_v16, %s1252_s14 }
 0x58b   :  { %v1062_v26 = vpop.eup %1061 }
 0x58c   :  { %v639_v32 = vmul.f32 %v1062_v26, %v634_v51 }
 0x5de   :  { %v1008_v24 = vpop.permute.xlu1 %1007  ;;  %v1013_v29 = vpop.permute.xlu2 %1012 }
 0x5df   :  { %v1010_v27 = vunpack.i.h.bf16 %v1008_v24  ;;  %v1009_v28 = vunpack.i.l.bf16 %v1008_v24  ;;  %v1015_v33 = vunpack.i.h.bf16 %v1013_v29  ;;  %v1014_v35 = vunpack.i.l.bf16 %v1013_v29 }
 0x5e1   :  { %v820_v36 = vsel %vm342_vm8, %v639_v32, %v1010_v27  ;;  %v577_v20 = vsel %vm342_vm8, %v396_v31, %v1009_v28 }
 0x5e2   :  { %v821_v41 = vsel %vm578_vm1, %v820_v36, %v1015_v33  ;;  %v579_v34 = vsel %vm578_vm1, %v577_v20, %v1014_v35 }
 0x5fa   :  { %v1018_v37 = vpop.permute.xlu0 %1017 }
 0x5fb   :  { %v1020_v38 = vunpack.i.h.bf16 %v1018_v37  ;;  %v1019_v40 = vunpack.i.l.bf16 %v1018_v37 }
 0x5fd   :  { %v581_v42 = vsel %vm580_vm2, %v579_v34, %v1019_v40  ;;  %v822_v43 = vsel %vm580_vm2, %v821_v41, %v1020_v38 }
 0x5fe   :  { %v823_v44 = vpack.c.bf16 %v822_v43, %v581_v42 }
 0x600   :  { %974 = vmatmul.msk.bf16.vlgmr.msra.gmra.mxu0 %vm180_vm0, %v823_v44 }
 0x67d   :  { %v872_v45 = vpop.f32.mrf.mxu0 }
 0x67e   :  { %v873_v46 = vadd.f32 %v1022_v39, %v872_v45 }
 0x680   :  { %v877_v47 = vpack.c.bf16 %v873_v46, %v873_v46 }
 0x682   :  { %880 = vst.msk [vmem:[#allocation13] sm:$0xf] %vm879_vm3, %v877_v47 }
 0x685   :  { %v874_v48 = vpop.f32.mrf.mxu0 }
 0x686   :  { %v875_v49 = vadd.f32 %v1022_v39, %v874_v48 }
 0x688   :  { %v878_v50 = vpack.c.bf16 %v875_v49, %v875_v49 }
 0x68a   :  { %881 = vst.msk [vmem:[#allocation13 + $0x4] sm:$0xf] %vm879_vm3, %v878_v50 }
 0x68b   :  { %894 = dma.vmem_to_hbm [thread:$0]  %s887_s20, 128, %s889_s0, [#allocation4], %s1246_s23, %s1246_s23, %s1247_s24  }
 0x68c   :  { %1239 = dma.done.wait [#allocation4], 128  }
 0x68d   :  { %1240 = vsyncadd [#allocation4], 4294967168 }
 0x68e   :  { %899 = vsyncpa [#allocation3], 1 }
 0x68f   :  { %900 = vsyncpa [#allocation6], 1 }
 0x690   :  { %901 = vsyncpa [#allocation9], 1 }
 0x691   :  { %902 = vsyncpa [#allocation12], 1 }
 0x692   :  { %903 = vsyncpa [#allocation4], 1 }

</bundles_post_ra>
